<compile_context>
chip_gen: v5e
topology: v5e:2x2
jax: 0.10.0
libtpu: 0.0.40
codegen_flags: <defaults>
</compile_context>

<pallas_src>
import functools

import jax
import jax.numpy as jnp
from jax.experimental import pallas as pl
from jax.experimental.pallas import tpu as pltpu

_MiB = 1024 * 1024


# ---------------------------------------------------------------------------
# Kernels
# ---------------------------------------------------------------------------
def _se_fused_kernel(x_ref, w1t_ref, b1_ref, w2t_ref, b2_ref, o_ref, *, inv_hw):
    """Single-pass SE: pool + excite + scale on one (Bt, C, HW) slab."""
    x = x_ref[...]                                              # native dtype
    # Squeeze: AdaptiveAvgPool2d(1) == mean over spatial, f32 accumulation
    # without materializing an f32 copy of the tile.
    pooled = jnp.sum(x, axis=-1, dtype=jnp.float32) * inv_hw    # (Bt, C)
    # Excitation: Linear(C->hidden) + ReLU, Linear(hidden->C) + Sigmoid,
    # batched over Bt rows so the MXU sees real matmuls.
    h = jnp.dot(pooled, w1t_ref[...], preferred_element_type=jnp.float32)
    h = jnp.maximum(h + b1_ref[...], 0.0)                       # (Bt, hidden)
    g = jnp.dot(h, w2t_ref[...], preferred_element_type=jnp.float32)
    g = jax.nn.sigmoid(g + b2_ref[...])                         # (Bt, C)
    # Scale: dominant elementwise path stays in the input dtype.
    o_ref[...] = x * g.astype(x.dtype)[:, :, None]


def _se_pool_excite_kernel(x_ref, w1t_ref, b1_ref, w2t_ref, b2_ref, g_ref,
                           acc_ref, *, inv_hw, hw_total, hw_tile, needs_mask):
    """Two-pass fallback, pass 1: accumulate the spatial sum over HW tiles and
    emit the (Bt, C, 1) sigmoid gate on the last reduction step."""
    h_idx = pl.program_id(1)

    @pl.when(h_idx == 0)
    def _():
        acc_ref[...] = jnp.zeros_like(acc_ref)

    x = x_ref[...]                                              # (Bt, C, HWt)
    if needs_mask:
        # Mask spatial positions past the true H*W (padded last tile).
        col = jax.lax.broadcasted_iota(jnp.int32, x.shape, 2)
        x = jnp.where(h_idx * hw_tile + col < hw_total, x,
                      jnp.zeros((), x.dtype))
    acc_ref[...] += jnp.sum(x, axis=-1, dtype=jnp.float32)      # (Bt, C)

    @pl.when(h_idx == pl.num_programs(1) - 1)
    def _():
        pooled = acc_ref[...] * inv_hw
        h = jnp.dot(pooled, w1t_ref[...], preferred_element_type=jnp.float32)
        h = jnp.maximum(h + b1_ref[...], 0.0)
        g = jnp.dot(h, w2t_ref[...], preferred_element_type=jnp.float32)
        g_ref[...] = jax.nn.sigmoid(g + b2_ref[...])[:, :, None]


def _se_scale_kernel(x_ref, g_ref, o_ref):
    """Two-pass fallback, pass 2: o = x * gate (gate broadcast over spatial).
    Out-of-bounds lanes of a partial last tile are dropped by Pallas."""
    x = x_ref[...]                                              # (Bt, C, HWt)
    o_ref[...] = x * g_ref[...].astype(x.dtype)                 # (Bt, C, 1)


# ---------------------------------------------------------------------------
# Tiling / VMEM helpers
# ---------------------------------------------------------------------------
def _vmem_limit_bytes():
    """Generation-aware scoped-VMEM request: ~64 MiB on v5e/v6e (128 MiB
    physical), capped near 48 MiB on v7x (64 MiB physical per TensorCore)."""
    cap = None
    try:
        cap = getattr(pltpu.get_tpu_info(), "vmem_capacity_bytes", None)
    except Exception:
        cap = None
    if cap is None:
        return 48 * _MiB                    # safe everywhere (fits v7x)
    if cap >= 96 * _MiB:
        return 64 * _MiB                    # v5e / v6e class
    return min(48 * _MiB, (cap * 3) // 4)   # v7x class


def _pick_batch_tile(B, per_batch_block_bytes, budget_bytes):
    """Largest divisor of B whose double-buffered in+out blocks fit `budget`,
    preferring an even grid with >= 4 steps (v7x megacore), then >= 2 steps
    (pipelining).  Returns None if even Bt=1 does not fit (two-pass fallback)."""
    fits = [d for d in range(1, B + 1)
            if B % d == 0 and 4 * d * per_batch_block_bytes <= budget_bytes]
    if not fits:
        return None
    for ok in (lambda d: (B // d) >= 4 and (B // d) % 2 == 0,
               lambda d: (B // d) >= 2,
               lambda d: True):
        sel = [d for d in fits if ok(d)]
        if sel:
            return max(sel)


# ---------------------------------------------------------------------------
# Wrapper
# ---------------------------------------------------------------------------
def se_layer(x, w1, b1, w2, b2, *, force_two_pass=False):
    """SELayer forward.  x: (B, C, H, W) NCHW.  PyTorch nn.Linear-shaped
    params: w1 (hidden, C), b1 (hidden,), w2 (C, hidden), b2 (C,).

    Wrap in jax.jit (params as constants or donated) so the tiny w.T /
    reshape ops below const-fold / fuse instead of being emitted per call."""
    B, C, H, W = x.shape
    HW = H * W
    hidden = w1.shape[0]
    itemsize = jnp.dtype(x.dtype).itemsize

    x2 = x.reshape(B, C, HW)
    w1t = w1.T                      # (C, hidden)
    w2t = w2.T                      # (hidden, C)
    b1r = b1.reshape(1, hidden)
    b2r = b2.reshape(1, C)

    vmem_limit = _vmem_limit_bytes()
    weight_bytes = 2 * (w1t.size * w1t.dtype.itemsize +
                        b1r.size * b1r.dtype.itemsize +
                        w2t.size * w2t.dtype.itemsize +
                        b2r.size * b2r.dtype.itemsize)
    budget = vmem_limit - weight_bytes - 2 * _MiB   # slack for compiler scratch

    cost = pl.CostEstimate(
        flops=2 * B * C * HW + 4 * B * C * hidden,
        transcendentals=B * C,
        bytes_accessed=2 * B * C * HW * itemsize)

    Bt = None if force_two_pass else _pick_batch_tile(B, C * HW * itemsize, budget)

    if Bt is not None:
        # ------------------- single-pass fused kernel ----------------------
        out = pl.pallas_call(
            functools.partial(_se_fused_kernel, inv_hw=1.0 / HW),
            out_shape=jax.ShapeDtypeStruct((B, C, HW), x.dtype),
            grid_spec=pltpu.PrefetchScalarGridSpec(
                num_scalar_prefetch=0,
                grid=(B // Bt,),
                in_specs=[
                    pl.BlockSpec((Bt, C, HW), lambda b: (b, 0, 0)),
                    pl.BlockSpec((C, hidden), lambda b: (0, 0)),   # w1.T
                    pl.BlockSpec((1, hidden), lambda b: (0, 0)),   # b1
                    pl.BlockSpec((hidden, C), lambda b: (0, 0)),   # w2.T
                    pl.BlockSpec((1, C), lambda b: (0, 0)),        # b2
                ],
                out_specs=pl.BlockSpec((Bt, C, HW), lambda b: (b, 0, 0)),
            ),
            compiler_params=pltpu.CompilerParams(
                dimension_semantics=("parallel",),
                vmem_limit_bytes=vmem_limit,
            ),
            cost_estimate=cost,
        )(x2, w1t, b1r, w2t, b2r)
        return out.reshape(B, C, H, W)

    # --------------- two-pass fallback for large C * HW slabs ---------------
    # Spatial tile: largest multiple of 128 whose double-buffered in+out blocks
    # of one batch row fit the budget.
    # TODO(synk): if C alone is so large that a (1, C, 128) block overflows the
    # budget, a channel-tiled pooling pass would also be needed.
    hwt = max(128, (max(budget, 0) // max(4 * C * itemsize, 1)) // 128 * 128)
    hwt = min(hwt, ((HW + 127) // 128) * 128)
    n_hw = (HW + hwt - 1) // hwt
    Bt2 = 1

    gate = pl.pallas_call(
        functools.partial(_se_pool_excite_kernel, inv_hw=1.0 / HW,
                          hw_total=HW, hw_tile=hwt,
                          needs_mask=(HW % hwt) != 0),
        out_shape=jax.ShapeDtypeStruct((B, C, 1), jnp.float32),
        grid_spec=pltpu.PrefetchScalarGridSpec(
            num_scalar_prefetch=0,
            grid=(B // Bt2, n_hw),
            in_specs=[
                pl.BlockSpec((Bt2, C, hwt), lambda b, h: (b, 0, h)),
                pl.BlockSpec((C, hidden), lambda b, h: (0, 0)),
                pl.BlockSpec((1, hidden), lambda b, h: (0, 0)),
                pl.BlockSpec((hidden, C), lambda b, h: (0, 0)),
                pl.BlockSpec((1, C), lambda b, h: (0, 0)),
            ],
            out_specs=pl.BlockSpec((Bt2, C, 1), lambda b, h: (b, 0, 0)),
            scratch_shapes=[pltpu.VMEM((Bt2, C), jnp.float32)],
        ),
        compiler_params=pltpu.CompilerParams(
            dimension_semantics=("parallel", "arbitrary"),
            vmem_limit_bytes=vmem_limit,
        ),
        cost_estimate=pl.CostEstimate(
            flops=B * C * HW + 4 * B * C * hidden,
            transcendentals=B * C,
            bytes_accessed=B * C * HW * itemsize),
    )(x2, w1t, b1r, w2t, b2r)

    out = pl.pallas_call(
        _se_scale_kernel,
        out_shape=jax.ShapeDtypeStruct((B, C, HW), x.dtype),
        grid_spec=pltpu.PrefetchScalarGridSpec(
            num_scalar_prefetch=0,
            grid=(B // Bt2, n_hw),
            in_specs=[
                pl.BlockSpec((Bt2, C, hwt), lambda b, h: (b, 0, h)),
                pl.BlockSpec((Bt2, C, 1), lambda b, h: (b, 0, 0)),
            ],
            out_specs=pl.BlockSpec((Bt2, C, hwt), lambda b, h: (b, 0, h)),
        ),
        compiler_params=pltpu.CompilerParams(
            dimension_semantics=("parallel", "parallel"),
            vmem_limit_bytes=vmem_limit,
        ),
        cost_estimate=cost,
    )(x2, gate)
    return out.reshape(B, C, H, W)


def se_layer_ref(x, w1, b1, w2, b2):
    """Pure-JAX reference mirroring the PyTorch forward."""
    y = jnp.mean(x, axis=(2, 3))                 # (B, C)
    y = jnp.maximum(y @ w1.T + b1, 0.0)          # (B, hidden)
    y = jax.nn.sigmoid(y @ w2.T + b2)            # (B, C)
    return x * y[:, :, None, None]


if __name__ == "__main__":
    # SELayer(gate_channels=32, reduction_ratio=16) -> hidden = 2
    B, C, reduction_ratio = 2, 32, 16
    hidden = C // reduction_ratio

    key = jax.random.PRNGKey(0)
    kx, k1, k2, k3, k4 = jax.random.split(key, 5)
    # Deterministic synthetic parameters (PyTorch nn.Linear shapes).
    w1 = jax.random.normal(k1, (hidden, C), dtype=jnp.float32) * 0.1
    b1 = jax.random.normal(k2, (hidden,), dtype=jnp.float32) * 0.1
    w2 = jax.random.normal(k3, (C, hidden), dtype=jnp.float32) * 0.1
    b2 = jax.random.normal(k4, (C,), dtype=jnp.float32) * 0.1

    run = jax.jit(se_layer, static_argnames=("force_two_pass",))

    ok = True
    cases = (
        ((14, 14), False),   # fused path, masked stores (HW = 196)
        ((16, 16), False),   # fused path, lane-dense stores (HW = 256)
        ((14, 14), True),    # two-pass VMEM fallback path
    )
    for (H, W), force in cases:
        x = jax.random.normal(kx, (B, C, H, W), dtype=jnp.float32)
        out = jax.block_until_ready(run(x, w1, b1, w2, b2, force_two_pass=force))
        ref = jax.block_until_ready(se_layer_ref(x, w1, b1, w2, b2))
        ok &= (out.shape == x.shape and out.dtype == x.dtype and
               bool(jnp.allclose(out, ref, atol=1e-5, rtol=1e-5)))
    assert ok
    print("KERNEL_OK")
</pallas_src>

<mosaic_0001>
module attributes {stable_mosaic.version = 11 : i64} {
  func.func @_se_fused_kernel(%arg0: i32, %arg1: memref<1x32x196xf32, #tpu.memory_space<vmem>>, %arg2: memref<32x2xf32, #tpu.memory_space<vmem>>, %arg3: memref<1x2xf32, #tpu.memory_space<vmem>>, %arg4: memref<2x32xf32, #tpu.memory_space<vmem>>, %arg5: memref<1x32xf32, #tpu.memory_space<vmem>>, %arg6: memref<1x32x196xf32, #tpu.memory_space<vmem>>) attributes {dimension_semantics = [#tpu.dimension_semantics<parallel>], iteration_bounds = array<i64: 2>, scalar_prefetch = 0 : i64, scratch_operands = 0 : i64, tpu.core_type = #tpu.core_type<tc>, window_params = [{transform_indices = @transform_0, window_bounds = array<i64: 1, 32, 196>}, {pipeline_mode = #tpu.pipeline_mode<synchronous>, transform_indices = @transform_1, window_bounds = array<i64: 32, 2>}, {pipeline_mode = #tpu.pipeline_mode<synchronous>, transform_indices = @transform_2, window_bounds = array<i64: 1, 2>}, {pipeline_mode = #tpu.pipeline_mode<synchronous>, transform_indices = @transform_3, window_bounds = array<i64: 2, 32>}, {pipeline_mode = #tpu.pipeline_mode<synchronous>, transform_indices = @transform_4, window_bounds = array<i64: 1, 32>}, {transform_indices = @transform_5, window_bounds = array<i64: 1, 32, 196>}]} {
    %c0 = arith.constant 0 : index
    %c0_0 = arith.constant 0 : index
    %c0_1 = arith.constant 0 : index
    %0 = vector.load %arg1[%c0, %c0_0, %c0_1] : memref<1x32x196xf32, #tpu.memory_space<vmem>>, vector<1x32x196xf32>
    %cst = arith.constant dense<0.000000e+00> : vector<1x32xf32>
    %1 = vector.multi_reduction <add>, %0, %cst [2] : vector<1x32x196xf32> to vector<1x32xf32>
    %cst_2 = arith.constant 0.00510204071 : f32
    %2 = vector.broadcast %cst_2 : f32 to vector<1x32xf32>
    %3 = arith.mulf %1, %2 : vector<1x32xf32>
    %c0_3 = arith.constant 0 : index
    %c0_4 = arith.constant 0 : index
    %4 = vector.load %arg2[%c0_3, %c0_4] : memref<32x2xf32, #tpu.memory_space<vmem>>, vector<32x2xf32>
    %cst_5 = arith.constant dense<0.000000e+00> : vector<1x2xf32>
    %5 = tpu.matmul %3, %4, %cst_5 {dimension_numbers = #tpu.dot_dimension_numbers<[1], [0], [0], [1], [0, 0, 1, 1], [], []>} : vector<1x32xf32>, vector<32x2xf32>, vector<1x2xf32> -> vector<1x2xf32>
    %c0_6 = arith.constant 0 : index
    %c0_7 = arith.constant 0 : index
    %6 = vector.load %arg3[%c0_6, %c0_7] : memref<1x2xf32, #tpu.memory_space<vmem>>, vector<1x2xf32>
    %7 = arith.addf %5, %6 : vector<1x2xf32>
    %cst_8 = arith.constant 0.000000e+00 : f32
    %8 = vector.broadcast %cst_8 : f32 to vector<1x2xf32>
    %9 = arith.maximumf %7, %8 : vector<1x2xf32>
    %c0_9 = arith.constant 0 : index
    %c0_10 = arith.constant 0 : index
    %10 = vector.load %arg4[%c0_9, %c0_10] : memref<2x32xf32, #tpu.memory_space<vmem>>, vector<2x32xf32>
    %cst_11 = arith.constant dense<0.000000e+00> : vector<1x32xf32>
    %11 = tpu.matmul %9, %10, %cst_11 {dimension_numbers = #tpu.dot_dimension_numbers<[1], [0], [0], [1], [0, 0, 1, 1], [], []>} : vector<1x2xf32>, vector<2x32xf32>, vector<1x32xf32> -> vector<1x32xf32>
    %c0_12 = arith.constant 0 : index
    %c0_13 = arith.constant 0 : index
    %12 = vector.load %arg5[%c0_12, %c0_13] : memref<1x32xf32, #tpu.memory_space<vmem>>, vector<1x32xf32>
    %13 = arith.addf %11, %12 : vector<1x32xf32>
    %14 = arith.negf %13 : vector<1x32xf32>
    %15 = math.exp %14 : vector<1x32xf32>
    %cst_14 = arith.constant 1.000000e+00 : f32
    %16 = vector.broadcast %cst_14 : f32 to vector<1x32xf32>
    %17 = arith.addf %16, %15 : vector<1x32xf32>
    %18 = arith.divf %16, %17 : vector<1x32xf32>
    %19 = vector.shape_cast %18 : vector<1x32xf32> to vector<1x32x1xf32>
    %20 = vector.broadcast %19 : vector<1x32x1xf32> to vector<1x32x196xf32>
    %21 = arith.mulf %0, %20 : vector<1x32x196xf32>
    %c0_15 = arith.constant 0 : index
    %c0_16 = arith.constant 0 : index
    %c0_17 = arith.constant 0 : index
    %22 = vector.load %arg6[%c0_15, %c0_16, %c0_17] : memref<1x32x196xf32, #tpu.memory_space<vmem>>, vector<1x32x196xf32>
    tpu.vector_store %arg6[%c0_15, %c0_16, %c0_17], %21 {strides = array<i32>} : memref<1x32x196xf32, #tpu.memory_space<vmem>>, vector<1x32x196xf32>,
    return
  }
  func.func @transform_0(%arg0: i32) -> (i32, i32, i32) {
    %c0_i32 = arith.constant 0 : i32
    %c0_i32_0 = arith.constant 0 : i32
    %c0_i32_1 = arith.constant 0 : i32
    return %arg0, %c0_i32, %c0_i32_0 : i32, i32, i32
  }
  func.func @transform_1(%arg0: i32) -> (i32, i32) {
    %c0_i32 = arith.constant 0 : i32
    %c0_i32_0 = arith.constant 0 : i32
    %c0_i32_1 = arith.constant 0 : i32
    return %c0_i32, %c0_i32_0 : i32, i32
  }
  func.func @transform_2(%arg0: i32) -> (i32, i32) {
    %c0_i32 = arith.constant 0 : i32
    %c0_i32_0 = arith.constant 0 : i32
    %c0_i32_1 = arith.constant 0 : i32
    return %c0_i32, %c0_i32_0 : i32, i32
  }
  func.func @transform_3(%arg0: i32) -> (i32, i32) {
    %c0_i32 = arith.constant 0 : i32
    %c0_i32_0 = arith.constant 0 : i32
    %c0_i32_1 = arith.constant 0 : i32
    return %c0_i32, %c0_i32_0 : i32, i32
  }
  func.func @transform_4(%arg0: i32) -> (i32, i32) {
    %c0_i32 = arith.constant 0 : i32
    %c0_i32_0 = arith.constant 0 : i32
    %c0_i32_1 = arith.constant 0 : i32
    return %c0_i32, %c0_i32_0 : i32, i32
  }
  func.func @transform_5(%arg0: i32) -> (i32, i32, i32) {
    %c0_i32 = arith.constant 0 : i32
    %c0_i32_0 = arith.constant 0 : i32
    %c0_i32_1 = arith.constant 0 : i32
    return %arg0, %c0_i32, %c0_i32_0 : i32, i32, i32
  }
}

</mosaic_0001>

<bundles_post_ra>
// kernel: se_layer.1
= control target key start
LH: loop header
LB: loop body
LE: loop exit
PB: predicated region body
PF: predicated region fallthrough
CT: control target
= control target key end

     0   :  { %s519_s18 = smov 0   ;;  %s604_s0 = inlined_call_operand.vmem [shape: f32[2,32,196], index: 0, kind: input, shape index: {}]   ;;  %s605_s1 = inlined_call_operand.vmem [shape: f32[32,2], index: 1, kind: input, shape index: {}]   ;;  %s606_s2 = inlined_call_operand.vmem [shape: f32[1,2], index: 2, kind: input, shape index: {}]   ;;  %s607_s3 = inlined_call_operand.vmem [shape: f32[2,32], index: 3, kind: input, shape index: {}]   ;;  %s608_s4 = inlined_call_operand.vmem [shape: f32[1,32], index: 4, kind: input, shape index: {}]   ;;  %s609_s5 = inlined_call_operand.vmem [shape: f32[2,32,196], index: 5, kind: output, shape index: {}]  }
   0x1 LB: > { %s447_s19 = sadd.s32 4294967295, %s487_s18   ;;  %p451_p0 = scmp.ge.s32.totalorder %s487_s18, 1  ;;  %s487_s18 = sphi %s519_s18, %s15_s18  }
   0x2   : > { %p187_p1 = scmp.lt.s32.totalorder %s487_s18, 3 }
   0x4   : > { %p188_p2 = pnand %p451_p0, %p187_p1 }
   0x5   : > { %p215_p3 = scmp.lt.s32.totalorder (!%p188_p2), %s447_s19, 1 }
   0x6   : > { %191 = sbr.rel (%p188_p2) target bundleno = 558 (0x22e), region = 40 }
   0xb   : > { %s611_s19 = smov (!%p215_p3, %s447_s19), 1  ;;  %vm233_vm0 = vcmask 556032   ;;  %v257_v16 = vld [vmem:[%s605_s1 + $0x18] sm:$0xff]  ;;  %v256_v17 = vld [vmem:[%s605_s1 + $0x10] sm:$0xff]  ;;  %v255_v18 = vld [vmem:[%s605_s1 + $0x8] sm:$0xff]  ;;  %v263_v20 = vlaneseq  ;;  %vm268_vm1 = vcmask 130112  }
   0xc   : > { %s462_s20 = sshll.u32 %s611_s19, 6  ;;  %293 = vmatpush.msra.mxu0 %v257_v16  ;;  %v254_v19 = vld [vmem:[%s605_s1] sm:$0xff]  ;;  %vm272_vm2 = vcmask 195712   ;;  %vm276_vm3 = vcmask 261312   ;;  %vm278_vm4 = vcmask 261120   ;;  %vm308_vm5 = vcmask 1041408  }
   0xd   : > { %s219_s23 = scalar_lea.vmem %s604_s0, %s462_s20  ;;  %v264_v23 = vand.u32 127, %v263_v20  ;;  %v302_v40 = vld [vmem:[%s607_s3] sm:$0x3]  ;;  %vm304_vm6 = vcmask 15360   ;;  %v353_v45 = vshrl.u32 %v263_v20, 7  ;;  %s224_s15 = scalar_lea.vmem %s609_s5, %s462_s20 }
   0xe   : > { %v535_v0 = vld [vmem:[%s219_s23] sm:$0xff]  ;;  %v537_v1 = vld [vmem:[%s219_s23 + $0x8] sm:$0xff]  ;;  %v548_v7 = vld [vmem:[%s219_s23 + $0x18] sm:$0xff]  ;;  %294 = vmatpush.msra.mxu0 %v256_v17  ;;  %457 = vmatpush.msk.msra.mxu1 %vm308_vm5, %v302_v40 }
   0xf   : > { %v539_v2 = vld [vmem:[%s219_s23 + $0x20] sm:$0xff]  ;;  %v234_v3 = vsel %vm233_vm0, %v537_v1, 0.0  ;;  %v543_v4 = vld [vmem:[%s219_s23 + $0x28] sm:$0xff]  ;;  %v551_v9 = vld [vmem:[%s219_s23 + $0x38] sm:$0xff]  ;;  %v238_v11 = vsel %vm233_vm0, %v548_v7, 0.0  ;;  %v266_v25 = vadd.s32 4294967288, %v264_v23  ;;  %472 = vset.pattern.permute.xlu2 %v353_v45 }
  0x10   : > { %v235_v5 = vadd.f32 %v234_v3, %v535_v0  ;;  %v242_v6 = vsel %vm233_vm0, %v543_v4, 0.0  ;;  %v553_v10 = vld [vmem:[%s219_s23 + $0x10] sm:$0xff]  ;;  %v246_v13 = vsel %vm233_vm0, %v551_v9, 0.0  ;;  %295 = vmatpush.msra.mxu0 %v255_v18  ;;  %v270_v26 = vadd.s32 4294967280, %v264_v23  ;;  %v258_v41 = vld [vmem:[%s606_s2] sm:$0x1] }
  0x11   : > { %v243_v8 = vadd.f32 %v242_v6, %v539_v2  ;;  %v557_v12 = vld [vmem:[%s219_s23 + $0x30] sm:$0xff]  ;;  %v239_v14 = vadd.f32 %v238_v11, %v553_v10  ;;  %v274_v29 = vadd.s32 4294967272, %v264_v23  ;;  %v372_v46 = vadd.s32 24, %v353_v45  ;;  %v303_v48 = vld [vmem:[%s608_s4] sm:$0x1] }
  0x12   : > { %236 = vadd.xlane.f32.xlu0 %v235_v5  ;;  %v247_v15 = vadd.f32 %v246_v13, %v557_v12  ;;  %296 = vmatpush.msra.mxu0 %v254_v19  ;;  %v366_v47 = vadd.s32 16, %v353_v45  ;;  %v360_v5 = vadd.s32 8, %v353_v45 }
  0x13   : > { %244 = vadd.xlane.f32.xlu1 %v243_v8 }
  0x14   : > { %475 = vset.pattern.permute.xlu1 %v372_v46  ;;  %474 = vset.pattern.permute.xlu0 %v366_v47 }
  0x1a   : > { %240 = vadd.xlane.f32.xlu0 %v239_v14 }
  0x1b   : > { %248 = vadd.xlane.f32.xlu1 %v247_v15 }
  0x85   : > { %v237_v21 = vpop.xlane.xlu0 %236 }
  0x86   : > { %v245_v22 = vpop.xlane.xlu1 %244  ;;  %v250_v24 = vmul.f32 0.0051020407, %v237_v21 }
  0x87   : > { %v252_v27 = vmul.f32 0.0051020407, %v245_v22 }
  0x88   : > { %v265_v33 = vperm.slane %v250_v24, %v264_v23 }
  0x89   : > { %v271_v35 = vperm.slane %v252_v27, %v270_v26 }
  0x8d   : > { %v241_v28 = vpop.xlane.xlu0 %240 }
  0x8e   : > { %v251_v30 = vmul.f32 0.0051020407, %v241_v28  ;;  %v249_v31 = vpop.xlane.xlu1 %248 }
  0x8f   : > { %v253_v32 = vmul.f32 0.0051020407, %v249_v31 }
  0x90   : > { %v267_v34 = vperm.slane %v251_v30, %v266_v25 }
  0x91   : > { %v275_v36 = vperm.slane %v253_v32, %v274_v29 }
  0x92   : > { %v269_v37 = vsel %vm268_vm1, %v267_v34, %v265_v33 }
  0x93   : > { %v273_v38 = vsel %vm272_vm2, %v271_v35, %v269_v37 }
  0x94   : > { %v277_v39 = vsel %vm276_vm3, %v275_v36, %v273_v38 }
  0x95   : > { %456 = vmatmul.msk.f32.vlgmr.msra.gmra.mxu0 %vm278_vm4, %v277_v39 }
 0x112   : > { %v298_v42 = vpop.f32.mrf.mxu0 }
 0x113   : > { %v299_v43 = vadd.f32 %v298_v42, %v258_v41 }
 0x115   : > { %v301_v44 = vmax.f32 %v299_v43, 0.0 }
 0x117   : > { %458 = vmatmul.msk.f32.vlgmr.msra.gmra.mxu1 %vm304_vm6, %v301_v44 }
 0x194   : > { %v329_v49 = vpop.f32.mrf.mxu1 }
 0x195   : > { %v330_v50 = vadd.f32 %v329_v49, %v303_v48 }
 0x197   : > { %v459_v51 = vmul.f32 -1.442695, %v330_v50 }
 0x199   : > { %477 = vpow2.f32 %v459_v51 }
 0x19f   : > { %v478_v52 = vpop.eup %477 }
 0x1a0   : > { %v335_v53 = vadd.f32 1.0, %v478_v52 }
 0x1a2   : > { %479 = vrcp.f32 %v335_v53  ;;  %v347_v57 = vand.u32 2147483648, %v335_v53  ;;  %v345_v59 = vand.u32 2147483647, %v335_v53  ;;  %vm341_vm8 = vweird.f32 %v335_v53 }
 0x1a4   : > { %v348_v61 = vor.u32 1.1754944e-38, %v347_v57  ;;  %vm346_vm10 = vcmp.eq.f32.partialorder %v345_v59, 8.507059e+37 }
 0x1a8   : > { %v480_v54 = vpop.eup %479 }
 0x1a9   : > { %v337_v55 = vmul.f32 %v480_v54, %v335_v53  ;;  %vm342_vm7 = vweird.f32 %v480_v54 }
 0x1aa   : > { %vm343_vm9 = vmor %vm341_vm8, %vm342_vm7 }
 0x1ab   : > { %v338_v56 = vsub.f32 1.0, %v337_v55 }
 0x1ad   : > { %v339_v58 = vmul.f32 %v480_v54, %v338_v56 }
 0x1af   : > { %v340_v60 = vadd.f32 %v480_v54, %v339_v58 }
 0x1b1   : > { %v344_v62 = vsel %vm343_vm9, %v480_v54, %v340_v60 }
 0x1b2   : > { %v349_v63 = vsel %vm346_vm10, %v348_v61, %v344_v62 }
 0x1b3   : > { %v351_v3 = vperm.slane %v349_v63, 0 }
 0x1b5   : > { %374 = vperm.xlu1 %475, %v351_v3   ;;  %368 = vperm.xlu0 %474, %v351_v3  }
 0x1b6   : > { %356 = vperm.xlu2 %472, %v351_v3  }
 0x1bd   : > { %476 = vset.pattern.permute.xlu0 %v372_v46 }
 0x1be   : > { %473 = vset.pattern.permute.xlu2 %v360_v5 }
 0x1c6   : > { %362 = vperm.xlu2 %473, %v351_v3  }
 0x210   : > { %v357_v6 = vpop.permute.xlu2 %356 }
 0x211   : > { %v376_v8 = vmul.f32 %v357_v6, %v535_v0  ;;  %v377_v11 = vmul.f32 %v357_v6, %v537_v1 }
 0x213   : > { %384 = vst [vmem:[%s224_s15] sm:$0xff] %v376_v8 }
 0x214   : > { %385 = vst.msk [vmem:[%s224_s15 + $0x8] sm:$0xff] %vm233_vm0, %v377_v11 }
 0x220   : > { %v363_v13 = vpop.permute.xlu2 %362 }
 0x221   : > { %v378_v14 = vmul.f32 %v363_v13, %v553_v10  ;;  %v379_v15 = vmul.f32 %v363_v13, %v548_v7 }
 0x223   : > { %386 = vst [vmem:[%s224_s15 + $0x10] sm:$0xff] %v378_v14 }
 0x224   : > { %387 = vst.msk [vmem:[%s224_s15 + $0x18] sm:$0xff] %vm233_vm0, %v379_v15 }
 0x227   : > { %v375_v16 = vpop.permute.xlu1 %374  ;;  %v369_v17 = vpop.permute.xlu0 %368 }
 0x228   : > { %v382_v18 = vmul.f32 %v375_v16, %v557_v12  ;;  %v383_v19 = vmul.f32 %v375_v16, %v551_v9  ;;  %v380_v0 = vmul.f32 %v369_v17, %v539_v2  ;;  %v381_v1 = vmul.f32 %v369_v17, %v543_v4 }
 0x22a   : > { %390 = vst [vmem:[%s224_s15 + $0x30] sm:$0xff] %v382_v18 }
 0x22b   : > { %391 = vst.msk [vmem:[%s224_s15 + $0x38] sm:$0xff] %vm233_vm0, %v383_v19 }
 0x22c   : > { %388 = vst [vmem:[%s224_s15 + $0x20] sm:$0xff] %v380_v0 }
 0x22d   : > { %389 = vst.msk [vmem:[%s224_s15 + $0x28] sm:$0xff] %vm233_vm0, %v381_v1 }
 0x22e PF: > { %s15_s18 = sadd.s32 1, %s487_s18  }
 0x22f   : > { %p12_p4 = scmp.ge.s32.totalorder %s15_s18, 4  }
 0x231   :  { %14 = sbr.rel (!%p12_p4) target bundleno = 1 (0x1), region = 70 }

</bundles_post_ra>
